<compile_context>
chip_gen: v7x
topology: tpu7x:2x2x1
jax: 0.10.0
libtpu: 0.0.40
codegen_flags: <defaults>
</compile_context>

<pallas_src>
import jax
import jax.numpy as jnp
from jax.experimental import pallas as pl
from jax.experimental.pallas import tpu as pltpu


def _round_up(n, m):
    return ((n + m - 1) // m) * m


def _mlp_kernel(x_ref, w1_ref, b1_ref, w2_ref, b2_ref, o_ref):
    # x_ref:  (TILE_B, F) f32/bf16   w1_ref: (F, H) bf16
    # b1_ref: (1, H) f32             w2_ref: (1, H) f32
    # b2_ref: (1,) f32 in SMEM       o_ref:  (TILE_B, 1) f32

    # In-kernel bf16 cast (no extra HBM pre-pass), MXU matmul with f32 acc.
    x = x_ref[...].astype(jnp.bfloat16)
    h = jnp.dot(x, w1_ref[...], preferred_element_type=jnp.float32)
    h = jnp.maximum(h + b1_ref[...], 0.0)                  # bias + ReLU (f32 VPU)

    # Second linear has a single output unit: a degenerate M=1 MXU matmul is as
    # expensive as the first one, so do it on the VPU (multiply) + XLU (lane
    # reduce) instead.  Result is (TILE_B, 1) which matches the output layout.
    z = jnp.sum(h * w2_ref[...], axis=-1, keepdims=True)

    # f32 epilogue everywhere (v5e has no bf16 VPU/EUP path); b2 is an SMEM
    # scalar broadcast.
    o_ref[...] = jax.nn.sigmoid(z + b2_ref[0]).astype(o_ref.dtype)


def prepare_params(w1, b1, w2, b2):
    """Hoist transposes / reshapes / casts out of the per-call hot path.

    Args (PyTorch nn.Linear convention):
      w1: (H, F), b1: (H,), w2: (1, H), b2: (1,)
    """
    w1_t = jnp.asarray(w1).astype(jnp.bfloat16).T          # (F, H) bf16
    b1_r = jnp.asarray(b1, jnp.float32).reshape(1, -1)      # (1, H) f32
    w2_r = jnp.asarray(w2, jnp.float32).reshape(1, -1)      # (1, H) f32
    b2_r = jnp.asarray(b2, jnp.float32).reshape(-1)          # (1,)   f32 (SMEM)
    return w1_t, b1_r, w2_r, b2_r


def mlp_forward(x, params, *, target_tile_bytes=2 << 20):
    """Fused MLP forward: sigmoid(relu(x @ w1.T + b1) @ w2.T + b2).

    x: (B, F) float32/bfloat16; params from prepare_params(). Returns (B, 1) f32.
    """
    w1_t, b1_r, w2_r, b2_r = params
    B, F = x.shape
    H = w1_t.shape[1]
    x_isz = jnp.dtype(x.dtype).itemsize

    # ---- Per-generation VMEM budget (v7x: 64 MiB, v5e/v6e: 128 MiB). ----
    try:
        vmem_cap = int(pltpu.get_tpu_info().vmem_capacity_bytes)
    except Exception:  # pragma: no cover - conservative fallback (v7x size)
        vmem_cap = 64 << 20
    vmem_budget = int(vmem_cap * 0.6)

    # Fixed (weight-resident) VMEM + per-batch-row VMEM:
    #   x tile double-buffered + in-kernel bf16 copy + f32 h temp + out buffers.
    fixed = 2 * (F * H * 2) + 4 * (H * 4) + 1024
    per_row = 2 * F * x_isz + F * 2 + 2 * H * 4 + 2 * 4

    # Tile sized for >= ~2 MiB of streamed DMA per grid step (per-step overhead
    # ~0.35us otherwise dominates), capped by the VMEM budget, multiple of 128.
    tile_b = _round_up(max(1, target_tile_bytes // max(1, F * x_isz)), 128)
    tile_vmem_cap = max(vmem_budget - fixed, per_row * 128) // per_row
    tile_b = min(tile_b, max(128, (tile_vmem_cap // 128) * 128))

    if B <= tile_b:
        # Tiny problems: one grid step, no padding (8-sublane aligned).
        tile_b = _round_up(B, 8)
    if B >= 512 and pl.cdiv(B, tile_b) < 2:
        # v7x megacore: make sure the "parallel" axis has >= 2 steps.
        tile_b = _round_up(pl.cdiv(B, 2), 128)

    num_tiles = pl.cdiv(B, tile_b)  # ragged last tile handled by block bounds

    # Explicit VMEM limit with headroom (v5e scoped default is only 16 MiB).
    vmem_need = fixed + per_row * tile_b
    vmem_limit = int(min(max(int(1.5 * vmem_need) + (1 << 20), 16 << 20),
                         vmem_cap - (2 << 20)))

    cost = pl.CostEstimate(
        flops=2 * B * H * (F + 1),
        transcendentals=B,
        bytes_accessed=B * F * x_isz + B * 4 + F * H * 2 + 2 * H * 4 + 4,
    )

    out = pl.pallas_call(
        _mlp_kernel,
        out_shape=jax.ShapeDtypeStruct((B, 1), jnp.float32),
        grid=(num_tiles,),
        in_specs=[
            pl.BlockSpec((tile_b, F), lambda i: (i, 0)),    # streamed x tile
            pl.BlockSpec((F, H), lambda i: (0, 0)),         # resident w1 (bf16)
            pl.BlockSpec((1, H), lambda i: (0, 0)),         # b1
            pl.BlockSpec((1, H), lambda i: (0, 0)),         # w2
            pl.BlockSpec(memory_space=pltpu.MemorySpace.SMEM),  # b2 scalar
        ],
        out_specs=pl.BlockSpec((tile_b, 1), lambda i: (i, 0)),
        compiler_params=pltpu.CompilerParams(
            dimension_semantics=("parallel",),               # megacore on v7x
            vmem_limit_bytes=vmem_limit),
        cost_estimate=cost,
    )(x, w1_t, b1_r, w2_r, b2_r)

    return out  # already (B, 1), PyTorch layout


def _reference(x, w1, b1, w2, b2):
    # Matches kernel numerics: bf16 first matmul with f32 accumulation,
    # f32 elementwise second layer + sigmoid.
    xb = jnp.asarray(x).astype(jnp.bfloat16)
    w1b = jnp.asarray(w1).astype(jnp.bfloat16)
    h = jnp.dot(xb, w1b.T, preferred_element_type=jnp.float32) + b1
    h = jnp.maximum(h, 0.0)
    z = jnp.sum(h * w2, axis=-1, keepdims=True) + b2
    return jax.nn.sigmoid(z)


if __name__ == "__main__":
    key = jax.random.PRNGKey(0)
    B, F, H = 8, 32, 32  # batch, in_features, hidden

    kx, kw1, kb1, kw2, kb2 = jax.random.split(key, 5)
    x = jax.random.normal(kx, (B, F), dtype=jnp.float32)
    # PyTorch nn.Linear parameter shapes: weight (out, in), bias (out,)
    w1 = jax.random.normal(kw1, (H, F), dtype=jnp.float32) * 0.1
    b1 = jax.random.normal(kb1, (H,), dtype=jnp.float32) * 0.1
    w2 = jax.random.normal(kw2, (1, H), dtype=jnp.float32) * 0.1
    b2 = jax.random.normal(kb2, (1,), dtype=jnp.float32) * 0.1

    params = prepare_params(w1, b1, w2, b2)   # one-time, outside the hot path
    out = jax.block_until_ready(mlp_forward(x, params))

    ref = _reference(x, w1, b1, w2, b2)
    assert out.shape == (B, 1)
    assert jnp.allclose(out, ref, atol=1e-4, rtol=1e-4), float(
        jnp.max(jnp.abs(out - ref)))

    print("KERNEL_OK")
</pallas_src>

<mosaic_0001>
module attributes {stable_mosaic.version = 11 : i64} {
  func.func @_mlp_kernel(%arg0: i32, %arg1: memref<8x32xf32, #tpu.memory_space<vmem>>, %arg2: memref<32x32xbf16, #tpu.memory_space<vmem>>, %arg3: memref<1x32xf32, #tpu.memory_space<vmem>>, %arg4: memref<1x32xf32, #tpu.memory_space<vmem>>, %arg5: memref<1xf32, #tpu.memory_space<smem>>, %arg6: memref<8x1xf32, #tpu.memory_space<vmem>>) attributes {dimension_semantics = [#tpu.dimension_semantics<parallel>], iteration_bounds = array<i64: 1>, scalar_prefetch = 0 : i64, scratch_operands = 0 : i64, tpu.core_type = #tpu.core_type<tc>, window_params = [{transform_indices = @transform_0, window_bounds = array<i64: 8, 32>}, {pipeline_mode = #tpu.pipeline_mode<synchronous>, transform_indices = @transform_1, window_bounds = array<i64: 32, 32>}, {pipeline_mode = #tpu.pipeline_mode<synchronous>, transform_indices = @transform_2, window_bounds = array<i64: 1, 32>}, {pipeline_mode = #tpu.pipeline_mode<synchronous>, transform_indices = @transform_3, window_bounds = array<i64: 1, 32>}, {transform_indices = @transform_4, window_bounds = array<i64: 1>}, {transform_indices = @transform_5, window_bounds = array<i64: 8, 1>}]} {
    %c0 = arith.constant 0 : index
    %c0_0 = arith.constant 0 : index
    %0 = vector.load %arg1[%c0, %c0_0] : memref<8x32xf32, #tpu.memory_space<vmem>>, vector<8x32xf32>
    %1 = arith.truncf %0 : vector<8x32xf32> to vector<8x32xbf16>
    %c0_1 = arith.constant 0 : index
    %c0_2 = arith.constant 0 : index
    %2 = vector.load %arg2[%c0_1, %c0_2] : memref<32x32xbf16, #tpu.memory_space<vmem>>, vector<32x32xbf16>
    %cst = arith.constant dense<0.000000e+00> : vector<8x32xf32>
    %3 = tpu.matmul %1, %2, %cst {dimension_numbers = #tpu.dot_dimension_numbers<[1], [0], [0], [1], [0, 0, 1, 1], [], []>} : vector<8x32xbf16>, vector<32x32xbf16>, vector<8x32xf32> -> vector<8x32xf32>
    %c0_3 = arith.constant 0 : index
    %c0_4 = arith.constant 0 : index
    %4 = vector.load %arg3[%c0_3, %c0_4] : memref<1x32xf32, #tpu.memory_space<vmem>>, vector<1x32xf32>
    %5 = vector.broadcast %4 : vector<1x32xf32> to vector<8x32xf32>
    %6 = arith.addf %3, %5 : vector<8x32xf32>
    %cst_5 = arith.constant 0.000000e+00 : f32
    %7 = vector.broadcast %cst_5 : f32 to vector<8x32xf32>
    %8 = arith.maximumf %6, %7 : vector<8x32xf32>
    %c0_6 = arith.constant 0 : index
    %c0_7 = arith.constant 0 : index
    %9 = vector.load %arg4[%c0_6, %c0_7] : memref<1x32xf32, #tpu.memory_space<vmem>>, vector<1x32xf32>
    %10 = vector.broadcast %9 : vector<1x32xf32> to vector<8x32xf32>
    %11 = arith.mulf %8, %10 : vector<8x32xf32>
    %cst_8 = arith.constant dense<0.000000e+00> : vector<8xf32>
    %12 = vector.multi_reduction <add>, %11, %cst_8 [1] : vector<8x32xf32> to vector<8xf32>
    %13 = vector.shape_cast %12 : vector<8xf32> to vector<8x1xf32>
    %c0_9 = arith.constant 0 : index
    %14 = memref.load %arg5[%c0_9] : memref<1xf32, #tpu.memory_space<smem>>
    %15 = vector.broadcast %14 : f32 to vector<8x1xf32>
    %16 = arith.addf %13, %15 : vector<8x1xf32>
    %17 = arith.negf %16 : vector<8x1xf32>
    %18 = math.exp %17 : vector<8x1xf32>
    %cst_10 = arith.constant 1.000000e+00 : f32
    %19 = vector.broadcast %cst_10 : f32 to vector<8x1xf32>
    %20 = arith.addf %19, %18 : vector<8x1xf32>
    %21 = arith.divf %19, %20 : vector<8x1xf32>
    %c0_11 = arith.constant 0 : index
    %c0_12 = arith.constant 0 : index
    %22 = vector.load %arg6[%c0_11, %c0_12] : memref<8x1xf32, #tpu.memory_space<vmem>>, vector<8x1xf32>
    tpu.vector_store %arg6[%c0_11, %c0_12], %21 {strides = array<i32>} : memref<8x1xf32, #tpu.memory_space<vmem>>, vector<8x1xf32>,
    return
  }
  func.func @transform_0(%arg0: i32) -> (i32, i32) {
    %c0_i32 = arith.constant 0 : i32
    %c0_i32_0 = arith.constant 0 : i32
    return %arg0, %c0_i32 : i32, i32
  }
  func.func @transform_1(%arg0: i32) -> (i32, i32) {
    %c0_i32 = arith.constant 0 : i32
    %c0_i32_0 = arith.constant 0 : i32
    %c0_i32_1 = arith.constant 0 : i32
    return %c0_i32, %c0_i32_0 : i32, i32
  }
  func.func @transform_2(%arg0: i32) -> (i32, i32) {
    %c0_i32 = arith.constant 0 : i32
    %c0_i32_0 = arith.constant 0 : i32
    %c0_i32_1 = arith.constant 0 : i32
    return %c0_i32, %c0_i32_0 : i32, i32
  }
  func.func @transform_3(%arg0: i32) -> (i32, i32) {
    %c0_i32 = arith.constant 0 : i32
    %c0_i32_0 = arith.constant 0 : i32
    %c0_i32_1 = arith.constant 0 : i32
    return %c0_i32, %c0_i32_0 : i32, i32
  }
  func.func @transform_4(%arg0: i32) -> i32 {
    %c0_i32 = arith.constant 0 : i32
    %c0_i32_0 = arith.constant 0 : i32
    return %c0_i32 : i32
  }
  func.func @transform_5(%arg0: i32) -> (i32, i32) {
    %c0_i32 = arith.constant 0 : i32
    %c0_i32_0 = arith.constant 0 : i32
    return %arg0, %c0_i32 : i32, i32
  }
}

</mosaic_0001>

<bundles_post_ra>
// kernel: tpu_custom_call.1
= control target key start
LH: loop header
LB: loop body
LE: loop exit
PB: predicated region body
PF: predicated region fallthrough
CT: control target
= control target key end

     0   :  { %11 = vsyncpa [#allocation4], 0  ;;  %s302_s0 = inlined_call_operand.hbm [shape: f32[8,32], index: 0, kind: input, shape index: {}]   ;;  %s303_s1 = inlined_call_operand.hbm [shape: bf16[32,32], index: 1, kind: input, shape index: {}]   ;;  %s304_s2 = inlined_call_operand.vmem [shape: f32[1,32], index: 2, kind: input, shape index: {}]   ;;  %s305_s3 = inlined_call_operand.vmem [shape: f32[1,32], index: 3, kind: input, shape index: {}]   ;;  %s306_s4 = inlined_call_operand.<no memory space> [shape: f32[1], index: 4, kind: input, shape index: {}]   ;;  %s307_s5 = inlined_call_operand.vmem [shape: f32[8,1], index: 5, kind: output, shape index: {}]  }
   0x1   :  { %12 = vsyncpa [#allocation6], 0  ;;  %s223_s18 = smov [#allocation3]   ;;  %s224_s20 = smov [#allocation5]  }
   0x2   :  { %s19_s19 = sshll.u32 %s223_s18, 4  ;;  %s28_s21 = sshll.u32 %s224_s20, 4  ;;  %s20_s19 = int_to_ptr.vmem [resolvable:$true] %s19_s19  ;;  %s259_s21 = int_to_ptr.vmem [resolvable:$true] %s28_s21 }
   0x3   :  { %s175_s24 = scalar_lea.hbm %s302_s0, 128 }
   0x4   :  { %p176_p0 = scmp.ne.s32.totalorder %s302_s0, %s175_s24  ;;  %p179_p1 = scmp.lt.u32.totalorder %s175_s24, %s302_s0 }
   0x6   :  { %p181_p2 = pnand %p179_p1, %p176_p0 }
   0x8   :  { %184 = shalt.err (!%p181_p2)
}
   0x9   :  { %s185_s29 = scalar_lea.vmem %s20_s19, 128  ;;  %p190_p4 = scmp.lt.s32.totalorder %s20_s19, %s20_s19 }
   0xa   :  { %p186_p3 = scmp.ne.s32.totalorder %s20_s19, %s185_s29  ;;  %p191_p5 = scmp.lt.s32.totalorder %s185_s29, %s185_s29 }
   0xc   :  { %p192_p6 = por %p191_p5, %p190_p4 }
   0xe   :  { %p193_p7 = pnand %p192_p6, %p186_p3 }
  0x10   :  { %196 = shalt.err (!%p193_p7)
}
  0x11   :  { %22 = dma.hbm_to_vmem [thread:$0]  %s302_s0, 128, %s20_s19, [#allocation4]  }
  0x12   :  { %s197_s9 = scalar_lea.hbm %s303_s1, 256 }
  0x13   :  { %p198_p8 = scmp.ne.s32.totalorder %s303_s1, %s197_s9  ;;  %p201_p9 = scmp.lt.u32.totalorder %s197_s9, %s303_s1 }
  0x15   :  { %p203_p10 = pnand %p201_p9, %p198_p8 }
  0x17   :  { %206 = shalt.err (!%p203_p10)
}
  0x18   :  { %s207_s14 = scalar_lea.vmem %s259_s21, 256  ;;  %p212_p12 = scmp.lt.s32.totalorder %s259_s21, %s259_s21 }
  0x19   :  { %p208_p11 = scmp.ne.s32.totalorder %s259_s21, %s207_s14  ;;  %p213_p13 = scmp.lt.s32.totalorder %s207_s14, %s207_s14 }
  0x1b   :  { %p214_p0 = por %p213_p13, %p212_p12 }
  0x1d   :  { %p215_p1 = pnand %p214_p0, %p208_p11 }
  0x1f   :  { %218 = shalt.err (!%p215_p1)
}
  0x20   :  { %s225_s0 = smov 64   ;;  %s226_s15 = smov 4  }
  0x21   :  { %34 = dma.hbm_to_vmem [thread:$0]  %s303_s1, 256, %s259_s21, [#allocation6], %s225_s0, %s225_s0, %s226_s15  }
  0x22   :  { %219 = dma.done.wait [#allocation4], 128  }
  0x23   :  { %220 = vsyncadd [#allocation4], 4294967168 }
  0x24   :  { %221 = dma.done.wait [#allocation6], 256  }
  0x25   :  { %222 = vsyncadd [#allocation6], 4294967040  ;;  %v227_v0 = vmov 0.0   ;;  %vm228_vm0 = vmmov 0   ;;  %v169_v1 = vld [vmem:[#allocation5] sm:$0xff]   ;;  %v170_v2 = vld [vmem:[#allocation5 + $0x8] sm:$0xff]   ;;  %v130_v15 = vstv %s306_s4 }
  0x26   :  { %155 = vmatprep.subr.bf16.mxu0 %v227_v0  ;;  %159 = vmatprep.mubr.msk.bf16.mxu0 %vm228_vm0, %v227_v0  ;;  %v48_v3 = vld [vmem:[#allocation3] sm:$0xff]  ;;  %vm73_vm1 = vcmask 261120   ;;  %vm138_vm2 = vcmask 7168  }
  0x27   :  { %156 = vmatpush3.bf16.msra.mxu0 %v169_v1  ;;  %v49_v4 = vpack.c.bf16 %v48_v3, %v48_v3  ;;  %v146_v5 = vld [vmem:[%s304_s2] ss:$0 sm:$0xff] }
  0x28   :  { %157 = vmatprep.subr.bf16.mxu0 %v227_v0  ;;  %v150_v10 = vld [vmem:[%s305_s3] ss:$0 sm:$0xff] }
  0x2b   :  { %158 = vmatpush3.bf16.msra.mxu0 %v170_v2 }
  0x2e   :  { %160 = vmatmul.mubr.msk.bf16.vlgmr.msra.gmra.mrb[0].mxu0 %vm73_vm1, %v49_v4 }
 0x101   :  { %v111_v6 = vpop.f32.mrb[0].mxu0 }
 0x102   :  { %v112_v7 = vadd.f32 %v146_v5, %v111_v6  ;;  %v161_v8 = vpop.f32.mrb[1].mxu0 }
 0x103   :  { %v114_v9 = vpop.f32.mrb[2].mxu0 }
 0x104   :  { %v117_v11 = vmax.f32 %v112_v7, 0.0  ;;  %v162_v12 = vpop.f32.mrb[3].mxu0 }
 0x106   :  { %v125_v13 = vmul.f32 %v150_v10, %v117_v11 }
 0x108   :  { %v126_v14 = vsel %vm73_vm1, %v125_v13, 0.0 }
 0x109   :  { %127 = vadd.xlane.f32.xlu0 %v126_v14 }
 0x196   :  { %v128_v16 = vpop.xlane.xlu0 %127 }
 0x197   :  { %v131_v17 = vadd.f32 %v130_v15, %v128_v16 }
 0x199   :  { %v151_v18 = vmul.f32 -1.442695, %v131_v17 }
 0x19b   :  { %171 = vpow2.f32 %v151_v18 }
 0x1a5   :  { %v172_v19 = vpop.eup %171 }
 0x1a6   :  { %v135_v20 = vadd.f32 1.0, %v172_v19 }
 0x1a8   :  { %173 = vrcp.f32 %v135_v20 }
 0x1b2   :  { %v174_v21 = vpop.eup %173 }
 0x1b3   :  { %139 = vst.msk [vmem:[%s307_s5] sm:$0xff] %vm138_vm2, %v174_v21 }
 0x1b4   :  { %144 = vsyncpa [#allocation4], 1 }
 0x1b5   :  { %145 = vsyncpa [#allocation6], 1 }

</bundles_post_ra>
